<compile_context>
chip_gen: v6e
topology: v6e:2x2x1
jax: 0.10.0
libtpu: 0.0.40
codegen_flags: <defaults>
</compile_context>

<pallas_src>
import jax
import jax.numpy as jnp
from jax.experimental import pallas as pl
from jax.experimental.pallas import tpu as pltpu

CLEN = 4
CIN = 1024
XDIM = 256
HID1, HID2 = 128, 64


def regnet_kernel(x_ref, xc_ref, wc_ref,
                  w1a_ref, w1bs_ref, b1_ref,
                  w2_ref, b2_ref,
                  w3_ref, b3_ref,
                  out_ref, acc_ref):
    h = pl.program_id(1)
    nh = pl.num_programs(1)
    bt = x_ref.shape[0]                                      # static batch-block size

    @pl.when(h == 0)
    def _():
        acc_ref[...] = jnp.zeros_like(acc_ref)

    # ---- pool branch tile: 1x1 conv as (clen, Cin) @ (Cin, hw_tile) on the MXU,
    # one matmul per batch row in the block (bt is small & static -> unrolled).
    # xc stays in its native channels-first layout; bf16 inputs, f32 accumulation.
    for r in range(bt):
        conv = jnp.dot(wc_ref[...], xc_ref[r],
                       preferred_element_type=jnp.float32)    # (clen, hw_tile) f32
        conv = jnp.maximum(conv, 0.0)                         # ReLU before pooling
        acc_ref[:, r:r + 1] += jnp.sum(conv, axis=1, keepdims=True)

    # ---- finalize: fc head once per batch block, after the last HW tile.
    @pl.when(h == nh - 1)
    def _():
        # xcf @ W1b with the 1/HW pooling scale folded into w1bs.
        xcf = acc_ref[...].T                                  # (bt, clen) tiny transpose
        xcf_h1 = jnp.dot(xcf, w1bs_ref[...],
                         preferred_element_type=jnp.float32)  # (bt, HID1)
        h1 = jnp.dot(x_ref[...], w1a_ref[...],
                     preferred_element_type=jnp.float32)
        h1 = jnp.maximum(h1 + xcf_h1 + b1_ref[...], 0.0)
        # Dropout(p=0.2): identity at inference.
        h2 = jnp.dot(h1, w2_ref[...], preferred_element_type=jnp.float32) + b2_ref[...]
        h2 = jnp.maximum(h2, 0.0)
        # Dropout(p=0.2): identity at inference.
        out = jnp.dot(h2, w3_ref[...], preferred_element_type=jnp.float32) + b3_ref[...]
        out_ref[...] = out.astype(out_ref.dtype)


def init_params(key):
    ks = jax.random.split(key, 7)
    return {
        # Conv2d(1024, clen, 1x1, bias=False) weight in its native (out, in) layout.
        "wc":  jax.random.normal(ks[0], (CLEN, CIN), jnp.float32) * 0.02,
        # Linear(256+clen, 128) split: rows acting on x and rows acting on xcf, transposed.
        "w1a": jax.random.normal(ks[1], (XDIM, HID1), jnp.float32) * 0.01,
        "w1b": jax.random.normal(ks[2], (CLEN, HID1), jnp.float32) * 0.01,
        "b1":  jnp.zeros((1, HID1), jnp.float32),
        # Linear(128, 64), transposed.
        "w2":  jax.random.normal(ks[3], (HID1, HID2), jnp.float32) * 0.01,
        "b2":  jnp.zeros((1, HID2), jnp.float32),
        # Linear(64, 1), transposed.
        "w3":  jax.random.normal(ks[4], (HID2, 1), jnp.float32) * 0.01,
        "b3":  jnp.zeros((1, 1), jnp.float32),
    }


def _pick_hw_tile(hw):
    """Largest HW tile that is a multiple of 128 (or the full extent) and divides HW."""
    if hw % 128 != 0:
        return hw                      # small/irregular spatial extent: single tile
    t = min(hw, 512)
    while hw % t != 0:
        t -= 128
    return t


def _pick_batch_tile(batch, hw_tile, itemsize):
    """Rows per grid step: amortize per-step overhead while keeping the
    double-buffered xc tile comfortably inside VMEM (<= ~4 MiB per buffer)."""
    per_row = CIN * hw_tile * itemsize
    budget = 4 * 1024 * 1024
    max_rows = int(max(1, min(batch, 32, budget // max(per_row, 1))))
    divisors = [d for d in range(1, max_rows + 1) if batch % d == 0]
    preferred = [d for d in divisors if d % 8 == 0 or d == batch]
    return max(preferred) if preferred else max(divisors)


def regnet_forward(x, xc_nchw, params):
    B = x.shape[0]
    Hs, Ws = xc_nchw.shape[2], xc_nchw.shape[3]
    HW = Hs * Ws

    # Free reshape of the native NCHW layout -> (B, Cin, HW). No transpose,
    # no extra HBM pass over the dominant operand.
    xc = xc_nchw.reshape(B, CIN, HW)
    # Match the tiny conv weight to the activation dtype (bf16 recommended);
    # accumulation inside the kernel stays f32.
    wc = params["wc"].astype(xc.dtype)
    # Fold the 1/HW pooling scale into the xcf branch of the first Linear so the
    # in-kernel spatial reduction is a pure running sum.
    w1bs = params["w1b"] * (1.0 / HW)

    hw_tile = _pick_hw_tile(HW)
    n_hw = HW // hw_tile
    bt = _pick_batch_tile(B, hw_tile, xc.dtype.itemsize)
    grid = (B // bt, n_hw)

    def bcast(shape):
        nd = len(shape)
        return pl.BlockSpec(shape, lambda b, h, _n=nd: (0,) * _n)

    in_specs = [
        pl.BlockSpec((bt, XDIM), lambda b, h: (b, 0)),             # x
        pl.BlockSpec((bt, CIN, hw_tile), lambda b, h: (b, 0, h)),  # xc (channels-first)
        bcast((CLEN, CIN)),                                        # wc
        bcast((XDIM, HID1)),                                       # w1a
        bcast((CLEN, HID1)),                                       # w1b (pre-scaled by 1/HW)
        bcast((1, HID1)),                                          # b1
        bcast((HID1, HID2)),                                       # w2
        bcast((1, HID2)),                                          # b2
        bcast((HID2, 1)),                                          # w3
        bcast((1, 1)),                                             # b3
    ]
    out_specs = pl.BlockSpec((bt, 1), lambda b, h: (b, 0))

    grid_spec = pltpu.PrefetchScalarGridSpec(
        num_scalar_prefetch=0,
        grid=grid,
        in_specs=in_specs,
        out_specs=out_specs,
        scratch_shapes=[pltpu.VMEM((CLEN, bt), jnp.float32)],      # per-block channel sums
    )

    return pl.pallas_call(
        regnet_kernel,
        out_shape=jax.ShapeDtypeStruct((B, 1), jnp.float32),
        grid_spec=grid_spec,
        compiler_params=pltpu.CompilerParams(
            dimension_semantics=("parallel", "arbitrary"),   # batch across cores, HW = reduction
            vmem_limit_bytes=32 * 1024 * 1024,               # explicit budget; safe on v5e/v6e/v7x
        ),
    )(x, xc, wc, params["w1a"], w1bs, params["b1"],
      params["w2"], params["b2"], params["w3"], params["b3"])


def regnet_reference(x, xc_nchw, params):
    """Pure-JAX reference matching the PyTorch forward (eval mode)."""
    xc_f32 = xc_nchw.astype(jnp.float32)
    # Mirror the kernel's weight quantization (wc cast to the activation dtype).
    wc = params["wc"].astype(xc_nchw.dtype).astype(jnp.float32)
    conv = jnp.maximum(jnp.einsum("bchw,kc->bkhw", xc_f32, wc), 0.0)
    xcf = jnp.mean(conv, axis=(2, 3))                                  # (B, clen)
    feat = jnp.concatenate([x, xcf], axis=1)                           # (B, 260)
    w1 = jnp.concatenate([params["w1a"], params["w1b"]], axis=0)       # (260, 128)
    h1 = jnp.maximum(feat @ w1 + params["b1"], 0.0)
    h2 = jnp.maximum(h1 @ params["w2"] + params["b2"], 0.0)
    return h2 @ params["w3"] + params["b3"]


if __name__ == "__main__":
    key = jax.random.PRNGKey(0)
    kx, kxc, kp = jax.random.split(key, 3)

    B, Hs, Ws = 2, 4, 4
    x = jax.random.normal(kx, (B, XDIM), jnp.float32)                      # (2, 256)
    # xc arrives in its native NCHW layout and in bf16 (as an upstream backbone
    # would hand it off); the kernel consumes it with only a free reshape.
    xc = jax.random.normal(kxc, (B, CIN, Hs, Ws), jnp.float32).astype(jnp.bfloat16)
    params = init_params(kp)

    out = jax.block_until_ready(regnet_forward(x, xc, params))
    ref = regnet_reference(x, xc, params)

    assert out.shape == (B, 1), out.shape
    assert jnp.allclose(out, ref, atol=2e-3, rtol=2e-3), (out, ref)

    print("KERNEL_OK")
</pallas_src>

<mosaic_0001>
module attributes {stable_mosaic.version = 11 : i64} {
  func.func @regnet_kernel(%arg0: i32, %arg1: i32, %arg2: memref<2x256xf32, #tpu.memory_space<vmem>>, %arg3: memref<2x1024x16xbf16, #tpu.memory_space<vmem>>, %arg4: memref<4x1024xbf16, #tpu.memory_space<vmem>>, %arg5: memref<256x128xf32, #tpu.memory_space<vmem>>, %arg6: memref<4x128xf32, #tpu.memory_space<vmem>>, %arg7: memref<1x128xf32, #tpu.memory_space<vmem>>, %arg8: memref<128x64xf32, #tpu.memory_space<vmem>>, %arg9: memref<1x64xf32, #tpu.memory_space<vmem>>, %arg10: memref<64x1xf32, #tpu.memory_space<vmem>>, %arg11: memref<1x1xf32, #tpu.memory_space<vmem>>, %arg12: memref<2x1xf32, #tpu.memory_space<vmem>>, %arg13: memref<4x2xf32, #tpu.memory_space<vmem>>) attributes {dimension_semantics = [#tpu.dimension_semantics<parallel>, #tpu.dimension_semantics<arbitrary>], iteration_bounds = array<i64: 1, 1>, scalar_prefetch = 0 : i64, scratch_operands = 1 : i64, tpu.core_type = #tpu.core_type<tc>, window_params = [{transform_indices = @transform_0, window_bounds = array<i64: 2, 256>}, {transform_indices = @transform_1, window_bounds = array<i64: 2, 1024, 16>}, {pipeline_mode = #tpu.pipeline_mode<synchronous>, transform_indices = @transform_2, window_bounds = array<i64: 4, 1024>}, {pipeline_mode = #tpu.pipeline_mode<synchronous>, transform_indices = @transform_3, window_bounds = array<i64: 256, 128>}, {pipeline_mode = #tpu.pipeline_mode<synchronous>, transform_indices = @transform_4, window_bounds = array<i64: 4, 128>}, {pipeline_mode = #tpu.pipeline_mode<synchronous>, transform_indices = @transform_5, window_bounds = array<i64: 1, 128>}, {pipeline_mode = #tpu.pipeline_mode<synchronous>, transform_indices = @transform_6, window_bounds = array<i64: 128, 64>}, {pipeline_mode = #tpu.pipeline_mode<synchronous>, transform_indices = @transform_7, window_bounds = array<i64: 1, 64>}, {pipeline_mode = #tpu.pipeline_mode<synchronous>, transform_indices = @transform_8, window_bounds = array<i64: 64, 1>}, {pipeline_mode = #tpu.pipeline_mode<synchronous>, transform_indices = @transform_9, window_bounds = array<i64: 1, 1>}, {transform_indices = @transform_10, window_bounds = array<i64: 2, 1>}]} {
    %c0_i32 = arith.constant 0 : i32
    %0 = arith.cmpi eq, %arg1, %c0_i32 : i32
    %1 = arith.extui %0 : i1 to i32
    %c0_i32_0 = arith.constant 0 : i32
    %2 = arith.cmpi ne, %1, %c0_i32_0 : i32
    scf.if %2 {
      %cst_24 = arith.constant 0.000000e+00 : f32
      %28 = vector.broadcast %cst_24 : f32 to vector<4x2xf32>
      %c0_25 = arith.constant 0 : index
      %c0_26 = arith.constant 0 : index
      %29 = vector.load %arg13[%c0_25, %c0_26] : memref<4x2xf32, #tpu.memory_space<vmem>>, vector<4x2xf32>
      tpu.vector_store %arg13[%c0_25, %c0_26], %28 {strides = array<i32>} : memref<4x2xf32, #tpu.memory_space<vmem>>, vector<4x2xf32>,
    } else {
    }
    %c0 = arith.constant 0 : index
    %c0_1 = arith.constant 0 : index
    %3 = vector.load %arg4[%c0, %c0_1] : memref<4x1024xbf16, #tpu.memory_space<vmem>>, vector<4x1024xbf16>
    %c0_2 = arith.constant 0 : index
    %c0_3 = arith.constant 0 : index
    %c0_4 = arith.constant 0 : index
    %4 = vector.load %arg3[%c0_2, %c0_3, %c0_4] : memref<2x1024x16xbf16, #tpu.memory_space<vmem>>, vector<1x1024x16xbf16>
    %5 = vector.shape_cast %4 : vector<1x1024x16xbf16> to vector<1024x16xbf16>
    %cst = arith.constant dense<0.000000e+00> : vector<4x16xf32>
    %6 = tpu.matmul %3, %5, %cst {dimension_numbers = #tpu.dot_dimension_numbers<[1], [0], [0], [1], [0, 0, 1, 1], [], []>} : vector<4x1024xbf16>, vector<1024x16xbf16>, vector<4x16xf32> -> vector<4x16xf32>
    %cst_5 = arith.constant 0.000000e+00 : f32
    %7 = vector.broadcast %cst_5 : f32 to vector<4x16xf32>
    %8 = arith.maximumf %6, %7 : vector<4x16xf32>
    %c0_6 = arith.constant 0 : index
    %c0_7 = arith.constant 0 : index
    %9 = vector.load %arg13[%c0_6, %c0_7] : memref<4x2xf32, #tpu.memory_space<vmem>>, vector<4x1xf32>
    %cst_8 = arith.constant dense<0.000000e+00> : vector<4xf32>
    %10 = vector.multi_reduction <add>, %8, %cst_8 [1] : vector<4x16xf32> to vector<4xf32>
    %11 = vector.shape_cast %10 : vector<4xf32> to vector<4x1xf32>
    %12 = arith.addf %9, %11 : vector<4x1xf32>
    %c0_9 = arith.constant 0 : index
    %c0_10 = arith.constant 0 : index
    %13 = vector.load %arg13[%c0_9, %c0_10] : memref<4x2xf32, #tpu.memory_space<vmem>>, vector<4x1xf32>
    tpu.vector_store %arg13[%c0_9, %c0_10], %12 {strides = array<i32>} : memref<4x2xf32, #tpu.memory_space<vmem>>, vector<4x1xf32>,
    %c0_11 = arith.constant 0 : index
    %c0_12 = arith.constant 0 : index
    %14 = vector.load %arg4[%c0_11, %c0_12] : memref<4x1024xbf16, #tpu.memory_space<vmem>>, vector<4x1024xbf16>
    %c1 = arith.constant 1 : index
    %c0_13 = arith.constant 0 : index
    %c0_14 = arith.constant 0 : index
    %15 = vector.load %arg3[%c1, %c0_13, %c0_14] : memref<2x1024x16xbf16, #tpu.memory_space<vmem>>, vector<1x1024x16xbf16>
    %16 = vector.shape_cast %15 : vector<1x1024x16xbf16> to vector<1024x16xbf16>
    %cst_15 = arith.constant dense<0.000000e+00> : vector<4x16xf32>
    %17 = tpu.matmul %14, %16, %cst_15 {dimension_numbers = #tpu.dot_dimension_numbers<[1], [0], [0], [1], [0, 0, 1, 1], [], []>} : vector<4x1024xbf16>, vector<1024x16xbf16>, vector<4x16xf32> -> vector<4x16xf32>
    %cst_16 = arith.constant 0.000000e+00 : f32
    %18 = vector.broadcast %cst_16 : f32 to vector<4x16xf32>
    %19 = arith.maximumf %17, %18 : vector<4x16xf32>
    %c0_17 = arith.constant 0 : index
    %c1_18 = arith.constant 1 : index
    %20 = vector.load %arg13[%c0_17, %c1_18] : memref<4x2xf32, #tpu.memory_space<vmem>>, vector<4x1xf32>
    %cst_19 = arith.constant dense<0.000000e+00> : vector<4xf32>
    %21 = vector.multi_reduction <add>, %19, %cst_19 [1] : vector<4x16xf32> to vector<4xf32>
    %22 = vector.shape_cast %21 : vector<4xf32> to vector<4x1xf32>
    %23 = arith.addf %20, %22 : vector<4x1xf32>
    %c0_20 = arith.constant 0 : index
    %c1_21 = arith.constant 1 : index
    %24 = vector.load %arg13[%c0_20, %c1_21] : memref<4x2xf32, #tpu.memory_space<vmem>>, vector<4x1xf32>
    tpu.vector_store %arg13[%c0_20, %c1_21], %23 {strides = array<i32>} : memref<4x2xf32, #tpu.memory_space<vmem>>, vector<4x1xf32>,
    %c0_i32_22 = arith.constant 0 : i32
    %25 = arith.cmpi eq, %arg1, %c0_i32_22 : i32
    %26 = arith.extui %25 : i1 to i32
    %c0_i32_23 = arith.constant 0 : i32
    %27 = arith.cmpi ne, %26, %c0_i32_23 : i32
    scf.if %27 {
      %c0_24 = arith.constant 0 : index
      %c0_25 = arith.constant 0 : index
      %28 = vector.load %arg13[%c0_24, %c0_25] : memref<4x2xf32, #tpu.memory_space<vmem>>, vector<4x2xf32>
      %29 = tpu.transpose %28, [1, 0] : vector<4x2xf32> -> vector<2x4xf32>
      %c0_26 = arith.constant 0 : index
      %c0_27 = arith.constant 0 : index
      %30 = vector.load %arg6[%c0_26, %c0_27] : memref<4x128xf32, #tpu.memory_space<vmem>>, vector<4x128xf32>
      %cst_28 = arith.constant dense<0.000000e+00> : vector<2x128xf32>
      %31 = tpu.matmul %29, %30, %cst_28 {dimension_numbers = #tpu.dot_dimension_numbers<[1], [0], [0], [1], [0, 0, 1, 1], [], []>} : vector<2x4xf32>, vector<4x128xf32>, vector<2x128xf32> -> vector<2x128xf32>
      %c0_29 = arith.constant 0 : index
      %c0_30 = arith.constant 0 : index
      %32 = vector.load %arg2[%c0_29, %c0_30] : memref<2x256xf32, #tpu.memory_space<vmem>>, vector<2x256xf32>
      %c0_31 = arith.constant 0 : index
      %c0_32 = arith.constant 0 : index
      %33 = vector.load %arg5[%c0_31, %c0_32] : memref<256x128xf32, #tpu.memory_space<vmem>>, vector<256x128xf32>
      %cst_33 = arith.constant dense<0.000000e+00> : vector<2x128xf32>
      %34 = tpu.matmul %32, %33, %cst_33 {dimension_numbers = #tpu.dot_dimension_numbers<[1], [0], [0], [1], [0, 0, 1, 1], [], []>} : vector<2x256xf32>, vector<256x128xf32>, vector<2x128xf32> -> vector<2x128xf32>
      %35 = arith.addf %34, %31 : vector<2x128xf32>
      %c0_34 = arith.constant 0 : index
      %c0_35 = arith.constant 0 : index
      %36 = vector.load %arg7[%c0_34, %c0_35] : memref<1x128xf32, #tpu.memory_space<vmem>>, vector<1x128xf32>
      %37 = vector.broadcast %36 : vector<1x128xf32> to vector<2x128xf32>
      %38 = arith.addf %35, %37 : vector<2x128xf32>
      %cst_36 = arith.constant 0.000000e+00 : f32
      %39 = vector.broadcast %cst_36 : f32 to vector<2x128xf32>
      %40 = arith.maximumf %38, %39 : vector<2x128xf32>
      %c0_37 = arith.constant 0 : index
      %c0_38 = arith.constant 0 : index
      %41 = vector.load %arg8[%c0_37, %c0_38] : memref<128x64xf32, #tpu.memory_space<vmem>>, vector<128x64xf32>
      %cst_39 = arith.constant dense<0.000000e+00> : vector<2x64xf32>
      %42 = tpu.matmul %40, %41, %cst_39 {dimension_numbers = #tpu.dot_dimension_numbers<[1], [0], [0], [1], [0, 0, 1, 1], [], []>} : vector<2x128xf32>, vector<128x64xf32>, vector<2x64xf32> -> vector<2x64xf32>
      %c0_40 = arith.constant 0 : index
      %c0_41 = arith.constant 0 : index
      %43 = vector.load %arg9[%c0_40, %c0_41] : memref<1x64xf32, #tpu.memory_space<vmem>>, vector<1x64xf32>
      %44 = vector.broadcast %43 : vector<1x64xf32> to vector<2x64xf32>
      %45 = arith.addf %42, %44 : vector<2x64xf32>
      %cst_42 = arith.constant 0.000000e+00 : f32
      %46 = vector.broadcast %cst_42 : f32 to vector<2x64xf32>
      %47 = arith.maximumf %45, %46 : vector<2x64xf32>
      %c0_43 = arith.constant 0 : index
      %c0_44 = arith.constant 0 : index
      %48 = vector.load %arg10[%c0_43, %c0_44] : memref<64x1xf32, #tpu.memory_space<vmem>>, vector<64x1xf32>
      %cst_45 = arith.constant dense<0.000000e+00> : vector<2x1xf32>
      %49 = tpu.matmul %47, %48, %cst_45 {dimension_numbers = #tpu.dot_dimension_numbers<[1], [0], [0], [1], [0, 0, 1, 1], [], []>} : vector<2x64xf32>, vector<64x1xf32>, vector<2x1xf32> -> vector<2x1xf32>
      %c0_46 = arith.constant 0 : index
      %c0_47 = arith.constant 0 : index
      %50 = vector.load %arg11[%c0_46, %c0_47] : memref<1x1xf32, #tpu.memory_space<vmem>>, vector<1x1xf32>
      %51 = vector.broadcast %50 : vector<1x1xf32> to vector<2x1xf32>
      %52 = arith.addf %49, %51 : vector<2x1xf32>
      %c0_48 = arith.constant 0 : index
      %c0_49 = arith.constant 0 : index
      %53 = vector.load %arg12[%c0_48, %c0_49] : memref<2x1xf32, #tpu.memory_space<vmem>>, vector<2x1xf32>
      tpu.vector_store %arg12[%c0_48, %c0_49], %52 {strides = array<i32>} : memref<2x1xf32, #tpu.memory_space<vmem>>, vector<2x1xf32>,
    } else {
    }
    return
  }
  func.func @transform_0(%arg0: i32, %arg1: i32) -> (i32, i32) {
    %c0_i32 = arith.constant 0 : i32
    %c0_i32_0 = arith.constant 0 : i32
    return %arg0, %c0_i32 : i32, i32
  }
  func.func @transform_1(%arg0: i32, %arg1: i32) -> (i32, i32, i32) {
    %c0_i32 = arith.constant 0 : i32
    %c0_i32_0 = arith.constant 0 : i32
    return %arg0, %c0_i32, %arg1 : i32, i32, i32
  }
  func.func @transform_2(%arg0: i32, %arg1: i32) -> (i32, i32) {
    %c0_i32 = arith.constant 0 : i32
    %c0_i32_0 = arith.constant 0 : i32
    %c0_i32_1 = arith.constant 0 : i32
    return %c0_i32, %c0_i32_0 : i32, i32
  }
  func.func @transform_3(%arg0: i32, %arg1: i32) -> (i32, i32) {
    %c0_i32 = arith.constant 0 : i32
    %c0_i32_0 = arith.constant 0 : i32
    %c0_i32_1 = arith.constant 0 : i32
    return %c0_i32, %c0_i32_0 : i32, i32
  }
  func.func @transform_4(%arg0: i32, %arg1: i32) -> (i32, i32) {
    %c0_i32 = arith.constant 0 : i32
    %c0_i32_0 = arith.constant 0 : i32
    %c0_i32_1 = arith.constant 0 : i32
    return %c0_i32, %c0_i32_0 : i32, i32
  }
  func.func @transform_5(%arg0: i32, %arg1: i32) -> (i32, i32) {
    %c0_i32 = arith.constant 0 : i32
    %c0_i32_0 = arith.constant 0 : i32
    %c0_i32_1 = arith.constant 0 : i32
    return %c0_i32, %c0_i32_0 : i32, i32
  }
  func.func @transform_6(%arg0: i32, %arg1: i32) -> (i32, i32) {
    %c0_i32 = arith.constant 0 : i32
    %c0_i32_0 = arith.constant 0 : i32
    %c0_i32_1 = arith.constant 0 : i32
    return %c0_i32, %c0_i32_0 : i32, i32
  }
  func.func @transform_7(%arg0: i32, %arg1: i32) -> (i32, i32) {
    %c0_i32 = arith.constant 0 : i32
    %c0_i32_0 = arith.constant 0 : i32
    %c0_i32_1 = arith.constant 0 : i32
    return %c0_i32, %c0_i32_0 : i32, i32
  }
  func.func @transform_8(%arg0: i32, %arg1: i32) -> (i32, i32) {
    %c0_i32 = arith.constant 0 : i32
    %c0_i32_0 = arith.constant 0 : i32
    %c0_i32_1 = arith.constant 0 : i32
    return %c0_i32, %c0_i32_0 : i32, i32
  }
  func.func @transform_9(%arg0: i32, %arg1: i32) -> (i32, i32) {
    %c0_i32 = arith.constant 0 : i32
    %c0_i32_0 = arith.constant 0 : i32
    %c0_i32_1 = arith.constant 0 : i32
    return %c0_i32, %c0_i32_0 : i32, i32
  }
  func.func @transform_10(%arg0: i32, %arg1: i32) -> (i32, i32) {
    %c0_i32 = arith.constant 0 : i32
    %c0_i32_0 = arith.constant 0 : i32
    return %arg0, %c0_i32 : i32, i32
  }
}

</mosaic_0001>

<bundles_post_ra>
// kernel: tpu_custom_call.1
= control target key start
LH: loop header
LB: loop body
LE: loop exit
PB: predicated region body
PF: predicated region fallthrough
CT: control target
= control target key end

     0   :  { %v2619_v22 = vmov 1983009808   ;;  %v180_v24 = vlaneseq  ;;  %vm42_vm0 = vcmask 11264   ;;  %vm764_vm1 = vcmask 125952   ;;  %s3333_s1 = inlined_call_operand.vmem [shape: bf16[2,1024,16], index: 1, kind: input, shape index: {}]   ;;  %s3334_s2 = inlined_call_operand.vmem [shape: bf16[4,1024], index: 2, kind: input, shape index: {}]   ;;  %s3335_s3 = inlined_call_operand.vmem [shape: f32[256,128], index: 3, kind: input, shape index: {}]   ;;  %s3336_s4 = inlined_call_operand.vmem [shape: f32[4,128], index: 4, kind: input, shape index: {}]   ;;  %s3337_s0 = inlined_call_operand.vmem [shape: f32[2,256], index: 0, kind: input, shape index: {}]   ;;  %s3338_s6 = inlined_call_operand.vmem [shape: f32[128,64], index: 6, kind: input, shape index: {}]   ;;  %s3339_s8 = inlined_call_operand.vmem [shape: f32[64,1], index: 8, kind: input, shape index: {}]   ;;  %s3340_s5 = inlined_call_operand.vmem [shape: f32[1,128], index: 5, kind: input, shape index: {}]   ;;  %s3341_s9 = inlined_call_operand.<no memory space> [shape: f32[1,1], index: 9, kind: input, shape index: {}]   ;;  %s3342_s7 = inlined_call_operand.vmem [shape: f32[1,64], index: 7, kind: input, shape index: {}]   ;;  %s3343_s10 = inlined_call_operand.vmem [shape: f32[2,1], index: 10, kind: output, shape index: {}]  }
   0x1   :  { %v2489_v0 = vld [vmem:[%s3333_s1 + $0x78] sm:$0xff]   ;;  %v2493_v4 = vld [vmem:[%s3333_s1 + $0x70] sm:$0xff]   ;;  %v2497_v8 = vld [vmem:[%s3333_s1 + $0x68] sm:$0xff]   ;;  %v178_v23 = vunpack.c.l.s4 %v2619_v22  ;;  %vm2621_vm2 = vmmov 0   ;;  %vm1539_vm3 = vcmask 1043456   ;;  %vm769_vm4 = vcmask 3072  }
   0x2   :  { %v2490_v1 = vld [vmem:[%s3333_s1 + $0xf8] sm:$0xff]   ;;  %2188 = vmatprep.subr.bf16.mxu0 %v2489_v0  ;;  %v2494_v5 = vld [vmem:[%s3333_s1 + $0xf0] sm:$0xff]   ;;  %v2498_v9 = vld [vmem:[%s3333_s1 + $0xe8] sm:$0xff]   ;;  %v181_v30 = vshrl.u32 %v180_v24, 7  ;;  %vm1496_vm5 = vcmask 11272   ;;  %vm1535_vm6 = vcmask 31744  }
   0x3   :  { %v2491_v2 = vld [vmem:[%s3333_s1 + $0x38] sm:$0xff]   ;;  %2210 = vmatprep.subr.bf16.mxu1 %v2490_v1  ;;  %v2495_v6 = vld [vmem:[%s3333_s1 + $0x30] sm:$0xff]   ;;  %v2499_v10 = vld [vmem:[%s3333_s1 + $0x28] sm:$0xff]   ;;  %v179_v29 = vunpack.c.0.s8 %v178_v23  ;;  %vm1845_vm7 = vcmask 523264   ;;  %vm1919_vm8 = vcmask 1024  }
   0x4   :  { %v2492_v3 = vld [vmem:[%s3333_s1 + $0xb8] sm:$0xff]   ;;  %2189 = vmatpush3.bf16.msra.mxu0 %v2491_v2  ;;  %v2496_v7 = vld [vmem:[%s3333_s1 + $0xb0] sm:$0xff]   ;;  %v2500_v11 = vld [vmem:[%s3333_s1 + $0xa8] sm:$0xff]  }
   0x5   :  { %2211 = vmatpush3.bf16.msra.mxu1 %v2492_v3  ;;  %2190 = vmatprep.subr.bf16.mxu0 %v2493_v4  ;;  %v2501_v12 = vld [vmem:[%s3333_s1 + $0x60] sm:$0xff]   ;;  %v2505_v16 = vld [vmem:[%s3333_s1 + $0x58] sm:$0xff]   ;;  %v2509_v20 = vld [vmem:[%s3333_s1 + $0x50] sm:$0xff]   ;;  %v2767_v35 = vsub.s32 %v179_v29, %v181_v30 }
   0x6   :  { %2212 = vmatprep.subr.bf16.mxu1 %v2494_v5  ;;  %v2502_v13 = vld [vmem:[%s3333_s1 + $0xe0] sm:$0xff]   ;;  %v2506_v17 = vld [vmem:[%s3333_s1 + $0xd8] sm:$0xff]   ;;  %v2510_v21 = vld [vmem:[%s3333_s1 + $0xd0] sm:$0xff]  }
   0x7   :  { %v2503_v14 = vld [vmem:[%s3333_s1 + $0x20] sm:$0xff]   ;;  %v2507_v18 = vld [vmem:[%s3333_s1 + $0x18] sm:$0xff]   ;;  %v2511_v25 = vld [vmem:[%s3333_s1 + $0x10] sm:$0xff]  }
   0x8   :  { %2191 = vmatpush3.bf16.msra.mxu0 %v2495_v6  ;;  %v2504_v15 = vld [vmem:[%s3333_s1 + $0xa0] sm:$0xff]   ;;  %v2508_v19 = vld [vmem:[%s3333_s1 + $0x98] sm:$0xff]   ;;  %v2512_v26 = vld [vmem:[%s3333_s1 + $0x90] sm:$0xff]  }
   0x9   :  { %2213 = vmatpush3.bf16.msra.mxu1 %v2496_v7  ;;  %2192 = vmatprep.subr.bf16.mxu0 %v2497_v8  ;;  %v2513_v27 = vld [vmem:[%s3333_s1 + $0x48] sm:$0xff]   ;;  %v2517_v33 = vld [vmem:[%s3333_s1 + $0x40] sm:$0xff]   ;;  %v2522_v41 = vld [vmem:[%s3333_s1 + $0x178] sm:$0xff]  }
   0xa   :  { %2214 = vmatprep.subr.bf16.mxu1 %v2498_v9  ;;  %v2514_v28 = vld [vmem:[%s3333_s1 + $0xc8] sm:$0xff]   ;;  %v2518_v34 = vld [vmem:[%s3333_s1 + $0xc0] sm:$0xff]   ;;  %v2523_v42 = vld [vmem:[%s3333_s1 + $0x1f8] sm:$0xff]  }
   0xb   :  { %v2515_v31 = vld [vmem:[%s3333_s1 + $0x8] sm:$0xff]   ;;  %v2519_v36 = vld [vmem:[%s3333_s1] sm:$0xff]   ;;  %v2524_v45 = vld [vmem:[%s3333_s1 + $0x138] sm:$0xff]  }
   0xc   :  { %2193 = vmatpush3.bf16.msra.mxu0 %v2499_v10  ;;  %v2516_v32 = vld [vmem:[%s3333_s1 + $0x88] sm:$0xff]   ;;  %v2520_v37 = vld [vmem:[%s3333_s1 + $0x80] sm:$0xff]   ;;  %v2525_v46 = vld [vmem:[%s3333_s1 + $0x1b8] sm:$0xff]  }
   0xd   :  { %2215 = vmatpush3.bf16.msra.mxu1 %v2500_v11  ;;  %2194 = vmatprep.subr.bf16.mxu0 %v2501_v12  ;;  %v44_v38 = vld [vmem:[%s3334_s2] sm:$0xff]  ;;  %v2526_v48 = vld [vmem:[%s3333_s1 + $0x170] sm:$0xff]   ;;  %v2530_v52 = vld [vmem:[%s3333_s1 + $0x168] sm:$0xff]  }
   0xe   :  { %2216 = vmatprep.subr.bf16.mxu1 %v2502_v13  ;;  %v2779_v39 = vrot.slane %v44_v38, %v2767_v35  ;;  %v176_v40 = vcombine.high %v44_v38, %v44_v38  ;;  %v2527_v49 = vld [vmem:[%s3333_s1 + $0x1f0] sm:$0xff]   ;;  %v2531_v53 = vld [vmem:[%s3333_s1 + $0x1e8] sm:$0xff]   ;;  %v2534_v56 = vld [vmem:[%s3333_s1 + $0x160] sm:$0xff]  }
   0xf   :  { %v2528_v50 = vld [vmem:[%s3333_s1 + $0x130] sm:$0xff]   ;;  %v2532_v54 = vld [vmem:[%s3333_s1 + $0x128] sm:$0xff]   ;;  %v2535_v57 = vld [vmem:[%s3333_s1 + $0x1e0] sm:$0xff]  }
  0x10   :  { %2195 = vmatpush3.bf16.msra.mxu0 %v2503_v14  ;;  %v2789_v43 = vcombine.high %v2779_v39, %v2779_v39  ;;  %v2792_v44 = vrot.slane %v176_v40, %v2767_v35  ;;  %v2529_v51 = vld [vmem:[%s3333_s1 + $0x1b0] sm:$0xff]   ;;  %v2533_v55 = vld [vmem:[%s3333_s1 + $0x1a8] sm:$0xff]   ;;  %v2536_v58 = vld [vmem:[%s3333_s1 + $0x120] sm:$0xff]  }
  0x11   :  { %2217 = vmatpush3.bf16.msra.mxu1 %v2504_v15  ;;  %2196 = vmatprep.subr.bf16.mxu0 %v2505_v16  ;;  %v2537_v59 = vld [vmem:[%s3333_s1 + $0x1a0] sm:$0xff]   ;;  %v2538_v60 = vld [vmem:[%s3333_s1 + $0x158] sm:$0xff]   ;;  %v2542_v0 = vld [vmem:[%s3333_s1 + $0x150] sm:$0xff]  }
  0x12   :  { %2218 = vmatprep.subr.bf16.mxu1 %v2506_v17  ;;  %634 = vmatprep.mubr.bf16.mxu0 %v2789_v43  ;;  %v2803_v47 = vcombine.high %v2792_v44, %v2792_v44  ;;  %v2539_v61 = vld [vmem:[%s3333_s1 + $0x1d8] sm:$0xff]   ;;  %v2543_v1 = vld [vmem:[%s3333_s1 + $0x1d0] sm:$0xff]   ;;  %v2546_v4 = vld [vmem:[%s3333_s1 + $0x148] sm:$0xff]  }
  0x13   :  { %v2540_v62 = vld [vmem:[%s3333_s1 + $0x118] sm:$0xff]   ;;  %v2544_v2 = vld [vmem:[%s3333_s1 + $0x110] sm:$0xff]   ;;  %v2547_v5 = vld [vmem:[%s3333_s1 + $0x1c8] sm:$0xff]  }
  0x14   :  { %2197 = vmatpush3.bf16.msra.mxu0 %v2507_v18  ;;  %674 = vmatprep.mubr.bf16.mxu1 %v2803_v47  ;;  %v2541_v63 = vld [vmem:[%s3333_s1 + $0x198] sm:$0xff]   ;;  %v2545_v3 = vld [vmem:[%s3333_s1 + $0x190] sm:$0xff]   ;;  %v2548_v6 = vld [vmem:[%s3333_s1 + $0x108] sm:$0xff]  }
  0x15   :  { %2219 = vmatpush3.bf16.msra.mxu1 %v2508_v19  ;;  %2198 = vmatprep.subr.bf16.mxu0 %v2509_v20  ;;  %v2549_v7 = vld [vmem:[%s3333_s1 + $0x188] sm:$0xff]   ;;  %v2550_v8 = vld [vmem:[%s3333_s1 + $0x140] sm:$0xff]   ;;  %v2555_v15 = vld [vmem:[%s3333_s1 + $0x278] sm:$0xff]  }
  0x16   :  { %2220 = vmatprep.subr.bf16.mxu1 %v2510_v21  ;;  %v2551_v9 = vld [vmem:[%s3333_s1 + $0x1c0] sm:$0xff]   ;;  %v45_v12 = vld [vmem:[%s3334_s2 + $0x8] sm:$0xff]  ;;  %v2556_v16 = vld [vmem:[%s3333_s1 + $0x2f8] sm:$0xff]  }
  0x17   :  { %v2552_v10 = vld [vmem:[%s3333_s1 + $0x100] sm:$0xff]   ;;  %v2896_v13 = vrot.slane %v45_v12, %v2767_v35  ;;  %v193_v14 = vcombine.high %v45_v12, %v45_v12  ;;  %v2557_v19 = vld [vmem:[%s3333_s1 + $0x238] sm:$0xff]   ;;  %v2559_v22 = vld [vmem:[%s3333_s1 + $0x270] sm:$0xff]  }
  0x18   :  { %2199 = vmatpush3.bf16.msra.mxu0 %v2511_v25  ;;  %v2553_v11 = vld [vmem:[%s3333_s1 + $0x180] sm:$0xff]   ;;  %v2558_v20 = vld [vmem:[%s3333_s1 + $0x2b8] sm:$0xff]   ;;  %v2560_v23 = vld [vmem:[%s3333_s1 + $0x2f0] sm:$0xff]  }
  0x19   :  { %2221 = vmatpush3.bf16.msra.mxu1 %v2512_v26  ;;  %2200 = vmatprep.subr.bf16.mxu0 %v2513_v27  ;;  %v2906_v17 = vcombine.high %v2896_v13, %v2896_v13  ;;  %v2909_v18 = vrot.slane %v193_v14, %v2767_v35  ;;  %v2561_v24 = vld [vmem:[%s3333_s1 + $0x230] sm:$0xff]   ;;  %v2563_v26 = vld [vmem:[%s3333_s1 + $0x268] sm:$0xff]   ;;  %v2567_v30 = vld [vmem:[%s3333_s1 + $0x260] sm:$0xff]  }
  0x1a   :  { %2222 = vmatprep.subr.bf16.mxu1 %v2514_v28  ;;  %v2562_v25 = vld [vmem:[%s3333_s1 + $0x2b0] sm:$0xff]   ;;  %v2564_v27 = vld [vmem:[%s3333_s1 + $0x2e8] sm:$0xff]   ;;  %v2572_v35 = vld [vmem:[%s3333_s1 + $0x2d8] sm:$0xff]  }
  0x1b   :  { %v2920_v21 = vcombine.high %v2909_v18, %v2909_v18  ;;  %v2565_v28 = vld [vmem:[%s3333_s1 + $0x228] sm:$0xff]   ;;  %v2575_v38 = vld [vmem:[%s3333_s1 + $0x250] sm:$0xff]  }
  0x1c   :  { %2201 = vmatpush3.bf16.msra.mxu0 %v2515_v31  ;;  %v2566_v29 = vld [vmem:[%s3333_s1 + $0x2a8] sm:$0xff]   ;;  %v2568_v31 = vld [vmem:[%s3333_s1 + $0x2e0] sm:$0xff]   ;;  %v2576_v40 = vld [vmem:[%s3333_s1 + $0x2d0] sm:$0xff]  }
  0x1d   :  { %2223 = vmatpush3.bf16.msra.mxu1 %v2516_v32  ;;  %2202 = vmatprep.subr.bf16.mxu0 %v2517_v33  ;;  %v2569_v32 = vld [vmem:[%s3333_s1 + $0x220] sm:$0xff]   ;;  %v2613_v12 = vld [vmem:[%s3333_s1 + $0x308] sm:$0xff]  }
  0x1e   :  { %2224 = vmatprep.subr.bf16.mxu1 %v2518_v34  ;;  %v2570_v33 = vld [vmem:[%s3333_s1 + $0x2a0] sm:$0xff]   ;;  %v2571_v34 = vld [vmem:[%s3333_s1 + $0x258] sm:$0xff]   ;;  %v2614_v14 = vld [vmem:[%s3333_s1 + $0x388] sm:$0xff]  }
  0x20   :  { %2203 = vmatpush3.bf16.msra.mxu0 %v2519_v36  ;;  %v2573_v36 = vld [vmem:[%s3333_s1 + $0x218] sm:$0xff]  }
  0x21   :  { %2225 = vmatpush3.bf16.msra.mxu1 %v2520_v37  ;;  %2232 = vmatprep.subr.bf16.mxu0 %v2522_v41  ;;  %v2574_v37 = vld [vmem:[%s3333_s1 + $0x298] sm:$0xff]   ;;  %v2577_v41 = vld [vmem:[%s3333_s1 + $0x210] sm:$0xff]  }
  0x22   :  { %2254 = vmatprep.subr.bf16.mxu1 %v2523_v42  ;;  %v2578_v42 = vld [vmem:[%s3333_s1 + $0x290] sm:$0xff]  }
  0x23   :  { %635 = vmatmul.mubr.bf16.vlgmr.msra.gmra.mxu0 %v2779_v39 }
  0x24   :  { %2233 = vmatpush3.bf16.msra.mxu0 %v2524_v45  ;;  %675 = vmatmul.mubr.bf16.vlgmr.msra.gmra.mxu1 %v2792_v44  ;;  %v2580_v45 = vld [vmem:[%s3333_s1 + $0x2c8] sm:$0xff]  }
  0x25   :  { %2234 = vmatprep.subr.bf16.mxu0 %v2526_v48  ;;  %2255 = vmatpush3.bf16.msra.mxu1 %v2525_v46  ;;  %v2581_v46 = vld [vmem:[%s3333_s1 + $0x208] sm:$0xff]   ;;  %v2583_v48 = vld [vmem:[%s3333_s1 + $0x240] sm:$0xff]  }
  0x26   :  { %2256 = vmatprep.subr.bf16.mxu1 %v2527_v49  ;;  %714 = vmatprep.mubr.bf16.mxu0 %v2906_v17  ;;  %v2584_v49 = vld [vmem:[%s3333_s1 + $0x2c0] sm:$0xff]  }
  0x27   :  { %754 = vmatprep.mubr.bf16.mxu1 %v2920_v21 }
  0x28   :  { %2235 = vmatpush3.bf16.msra.mxu0 %v2528_v50  ;;  %v2585_v50 = vld [vmem:[%s3333_s1 + $0x200] sm:$0xff]  }
  0x29   :  { %2236 = vmatprep.subr.bf16.mxu0 %v2530_v52  ;;  %2257 = vmatpush3.bf16.msra.mxu1 %v2529_v51  ;;  %v2586_v51 = vld [vmem:[%s3333_s1 + $0x280] sm:$0xff]   ;;  %v2587_v52 = vld [vmem:[%s3333_s1 + $0x378] sm:$0xff]  }
  0x2a   :  { %2258 = vmatprep.subr.bf16.mxu1 %v2531_v53  ;;  %v2588_v53 = vld [vmem:[%s3333_s1 + $0x3f8] sm:$0xff]  }
  0x2c   :  { %2237 = vmatpush3.bf16.msra.mxu0 %v2532_v54  ;;  %v2589_v54 = vld [vmem:[%s3333_s1 + $0x338] sm:$0xff]  }
  0x2d   :  { %2238 = vmatprep.subr.bf16.mxu0 %v2534_v56  ;;  %2259 = vmatpush3.bf16.msra.mxu1 %v2533_v55  ;;  %v2590_v55 = vld [vmem:[%s3333_s1 + $0x3b8] sm:$0xff]   ;;  %v2591_v56 = vld [vmem:[%s3333_s1 + $0x370] sm:$0xff]  }
  0x2e   :  { %2260 = vmatprep.subr.bf16.mxu1 %v2535_v57  ;;  %v2592_v57 = vld [vmem:[%s3333_s1 + $0x3f0] sm:$0xff]  }
  0x30   :  { %2239 = vmatpush3.bf16.msra.mxu0 %v2536_v58  ;;  %v2593_v58 = vld [vmem:[%s3333_s1 + $0x330] sm:$0xff]  }
  0x31   :  { %2240 = vmatprep.subr.bf16.mxu0 %v2538_v60  ;;  %2261 = vmatpush3.bf16.msra.mxu1 %v2537_v59  ;;  %v2594_v59 = vld [vmem:[%s3333_s1 + $0x3b0] sm:$0xff]   ;;  %v2596_v60 = vld [vmem:[%s3333_s1 + $0x3e8] sm:$0xff]  }
  0x32   :  { %2262 = vmatprep.subr.bf16.mxu1 %v2539_v61  ;;  %v2598_v61 = vld [vmem:[%s3333_s1 + $0x3a8] sm:$0xff]  }
  0x34   :  { %2241 = vmatpush3.bf16.msra.mxu0 %v2540_v62  ;;  %v2599_v62 = vld [vmem:[%s3333_s1 + $0x360] sm:$0xff]  }
  0x35   :  { %2242 = vmatprep.subr.bf16.mxu0 %v2542_v0  ;;  %2263 = vmatpush3.bf16.msra.mxu1 %v2541_v63  ;;  %v2600_v63 = vld [vmem:[%s3333_s1 + $0x3e0] sm:$0xff]  }
  0x36   :  { %2264 = vmatprep.subr.bf16.mxu1 %v2543_v1  ;;  %v2601_v0 = vld [vmem:[%s3333_s1 + $0x320] sm:$0xff]  }
  0x37   :  { %v2602_v1 = vld [vmem:[%s3333_s1 + $0x3a0] sm:$0xff]  }
  0x38   :  { %2243 = vmatpush3.bf16.msra.mxu0 %v2544_v2  ;;  %v2603_v2 = vld [vmem:[%s3333_s1 + $0x358] sm:$0xff]  }
  0x39   :  { %2244 = vmatprep.subr.bf16.mxu0 %v2546_v4  ;;  %2265 = vmatpush3.bf16.msra.mxu1 %v2545_v3  ;;  %v2604_v3 = vld [vmem:[%s3333_s1 + $0x3d8] sm:$0xff]  }
  0x3a   :  { %2266 = vmatprep.subr.bf16.mxu1 %v2547_v5  ;;  %v2605_v4 = vld [vmem:[%s3333_s1 + $0x318] sm:$0xff]  }
  0x3b   :  { %v2606_v5 = vld [vmem:[%s3333_s1 + $0x398] sm:$0xff]  }
  0x3c   :  { %2245 = vmatpush3.bf16.msra.mxu0 %v2548_v6  ;;  %v2607_v6 = vld [vmem:[%s3333_s1 + $0x350] sm:$0xff]  }
  0x3d   :  { %2246 = vmatprep.subr.bf16.mxu0 %v2550_v8  ;;  %2267 = vmatpush3.bf16.msra.mxu1 %v2549_v7  ;;  %v2608_v7 = vld [vmem:[%s3333_s1 + $0x3d0] sm:$0xff]  }
  0x3e   :  { %2268 = vmatprep.subr.bf16.mxu1 %v2551_v9  ;;  %v2609_v8 = vld [vmem:[%s3333_s1 + $0x310] sm:$0xff]  }
  0x3f   :  { %v2610_v9 = vld [vmem:[%s3333_s1 + $0x390] sm:$0xff]  }
  0x40   :  { %2247 = vmatpush3.bf16.msra.mxu0 %v2552_v10  ;;  %v2611_v10 = vld [vmem:[%s3333_s1 + $0x348] sm:$0xff]  }
  0x41   :  { %2276 = vmatprep.subr.bf16.mxu0 %v2555_v15  ;;  %2269 = vmatpush3.bf16.msra.mxu1 %v2553_v11  ;;  %v2612_v11 = vld [vmem:[%s3333_s1 + $0x3c8] sm:$0xff]   ;;  %v2615_v15 = vld [vmem:[%s3333_s1 + $0x340] sm:$0xff]  }
  0x42   :  { %2298 = vmatprep.subr.bf16.mxu1 %v2556_v16  ;;  %v2616_v16 = vld [vmem:[%s3333_s1 + $0x3c0] sm:$0xff]  }
  0x43   :  { %715 = vmatmul.mubr.bf16.vlgmr.msra.gmra.mxu0 %v2896_v13 }
  0x44   :  { %2277 = vmatpush3.bf16.msra.mxu0 %v2557_v19  ;;  %755 = vmatmul.mubr.bf16.vlgmr.msra.gmra.mxu1 %v2909_v18  ;;  %v2618_v19 = vld [vmem:[%s3333_s1 + $0x380] sm:$0xff]  }
  0x45   :  { %2278 = vmatprep.subr.bf16.mxu0 %v2559_v22  ;;  %2299 = vmatpush3.bf16.msra.mxu1 %v2558_v20  ;;  %v2620_v20 = vmov 0.0  }
  0x46   :  { %1362 = vmatprep.mubr.bf16.mxu0 %v2789_v43  ;;  %2300 = vmatprep.subr.bf16.mxu1 %v2560_v23  ;;  %v2579_v43 = vld [vmem:[%s3333_s1 + $0x248] sm:$0xff]   ;;  %43 = vst.msk [vmem:[#allocation2] sm:$0xf] %vm42_vm0, %v2620_v20 }
  0x47   :  { %1402 = vmatprep.mubr.bf16.mxu1 %v2803_v47  ;;  %v2582_v47 = vld [vmem:[%s3333_s1 + $0x288] sm:$0xff]  }
  0x48   :  { %2279 = vmatpush3.bf16.msra.mxu0 %v2561_v24 }
  0x49   :  { %2280 = vmatprep.subr.bf16.mxu0 %v2563_v26  ;;  %2301 = vmatpush3.bf16.msra.mxu1 %v2562_v25 }
  0x4a   :  { %2302 = vmatprep.subr.bf16.mxu1 %v2564_v27 }
  0x4c   :  { %2281 = vmatpush3.bf16.msra.mxu0 %v2565_v28 }
  0x4d   :  { %2282 = vmatprep.subr.bf16.mxu0 %v2567_v30  ;;  %2303 = vmatpush3.bf16.msra.mxu1 %v2566_v29 }
  0x4e   :  { %2304 = vmatprep.subr.bf16.mxu1 %v2568_v31 }
  0x50   :  { %2283 = vmatpush3.bf16.msra.mxu0 %v2569_v32 }
  0x51   :  { %2284 = vmatprep.subr.bf16.mxu0 %v2571_v34  ;;  %2305 = vmatpush3.bf16.msra.mxu1 %v2570_v33 }
  0x52   :  { %2306 = vmatprep.subr.bf16.mxu1 %v2572_v35 }
  0x54   :  { %2285 = vmatpush3.bf16.msra.mxu0 %v2573_v36 }
  0x55   :  { %2286 = vmatprep.subr.bf16.mxu0 %v2575_v38  ;;  %2307 = vmatpush3.bf16.msra.mxu1 %v2574_v37 }
  0x56   :  { %2308 = vmatprep.subr.bf16.mxu1 %v2576_v40 }
  0x58   :  { %2287 = vmatpush3.bf16.msra.mxu0 %v2577_v41 }
  0x59   :  { %2288 = vmatprep.subr.bf16.mxu0 %v2579_v43  ;;  %2309 = vmatpush3.bf16.msra.mxu1 %v2578_v42 }
  0x5a   :  { %2310 = vmatprep.subr.bf16.mxu1 %v2580_v45 }
  0x5c   :  { %2289 = vmatpush3.bf16.msra.mxu0 %v2581_v46 }
  0x5d   :  { %2290 = vmatprep.subr.bf16.mxu0 %v2583_v48  ;;  %2311 = vmatpush3.bf16.msra.mxu1 %v2582_v47 }
  0x5e   :  { %2312 = vmatprep.subr.bf16.mxu1 %v2584_v49 }
  0x60   :  { %2291 = vmatpush3.bf16.msra.mxu0 %v2585_v50 }
  0x61   :  { %2320 = vmatprep.subr.bf16.mxu0 %v2587_v52  ;;  %2313 = vmatpush3.bf16.msra.mxu1 %v2586_v51 }
  0x62   :  { %2342 = vmatprep.subr.bf16.mxu1 %v2588_v53 }
  0x63   :  { %1363 = vmatmul.mubr.bf16.vlgmr.msra.gmra.mxu0 %v2779_v39  ;;  %v2595_v39 = vld [vmem:[%s3333_s1 + $0x368] sm:$0xff]  }
  0x64   :  { %2321 = vmatpush3.bf16.msra.mxu0 %v2589_v54  ;;  %1442 = vmatprep.mubr.bf16.mxu0 %v2906_v17  ;;  %v2617_v17 = vld [vmem:[%s3333_s1 + $0x300] sm:$0xff]  }
  0x65   :  { %1403 = vmatmul.mubr.bf16.vlgmr.msra.gmra.mxu1 %v2792_v44  ;;  %2322 = vmatprep.subr.bf16.mxu0 %v2591_v56  ;;  %v2597_v44 = vld [vmem:[%s3333_s1 + $0x328] sm:$0xff]  }
  0x66   :  { %2343 = vmatpush3.bf16.msra.mxu1 %v2590_v55  ;;  %1482 = vmatprep.mubr.bf16.mxu1 %v2920_v21 }
  0x67   :  { %2344 = vmatprep.subr.bf16.mxu1 %v2592_v57 }
  0x68   :  { %2323 = vmatpush3.bf16.msra.mxu0 %v2593_v58 }
  0x69   :  { %2324 = vmatprep.subr.bf16.mxu0 %v2595_v39 }
  0x6a   :  { %2345 = vmatpush3.bf16.msra.mxu1 %v2594_v59 }
  0x6b   :  { %2346 = vmatprep.subr.bf16.mxu1 %v2596_v60 }
  0x6c   :  { %2325 = vmatpush3.bf16.msra.mxu0 %v2597_v44 }
  0x6d   :  { %2326 = vmatprep.subr.bf16.mxu0 %v2599_v62 }
  0x6e   :  { %2347 = vmatpush3.bf16.msra.mxu1 %v2598_v61 }
  0x6f   :  { %2348 = vmatprep.subr.bf16.mxu1 %v2600_v63 }
  0x70   :  { %2327 = vmatpush3.bf16.msra.mxu0 %v2601_v0 }
  0x71   :  { %2328 = vmatprep.subr.bf16.mxu0 %v2603_v2 }
  0x72   :  { %2349 = vmatpush3.bf16.msra.mxu1 %v2602_v1 }
  0x73   :  { %2350 = vmatprep.subr.bf16.mxu1 %v2604_v3 }
  0x74   :  { %2329 = vmatpush3.bf16.msra.mxu0 %v2605_v4 }
  0x75   :  { %2330 = vmatprep.subr.bf16.mxu0 %v2607_v6  ;;  %v1629_v6 = vld [vmem:[%s3335_s3 + $0x78] sm:$0xff] }
  0x76   :  { %2351 = vmatpush3.bf16.msra.mxu1 %v2606_v5  ;;  %v1645_v5 = vld [vmem:[%s3335_s3 + $0xf8] sm:$0xff] }
  0x77   :  { %2352 = vmatprep.subr.bf16.mxu1 %v2608_v7  ;;  %v1644_v7 = vld [vmem:[%s3335_s3 + $0xf0] sm:$0xff] }
  0x78   :  { %2331 = vmatpush3.bf16.msra.mxu0 %v2609_v8  ;;  %v1628_v8 = vld [vmem:[%s3335_s3 + $0x70] sm:$0xff] }
  0x79   :  { %2332 = vmatprep.subr.bf16.mxu0 %v2611_v10  ;;  %v1627_v10 = vld [vmem:[%s3335_s3 + $0x68] sm:$0xff] }
  0x7a   :  { %2353 = vmatpush3.bf16.msra.mxu1 %v2610_v9  ;;  %v1643_v9 = vld [vmem:[%s3335_s3 + $0xe8] sm:$0xff] }
  0x7b   :  { %2354 = vmatprep.subr.bf16.mxu1 %v2612_v11  ;;  %v1642_v11 = vld [vmem:[%s3335_s3 + $0xe0] sm:$0xff] }
  0x7c   :  { %2333 = vmatpush3.bf16.msra.mxu0 %v2613_v12  ;;  %v1626_v12 = vld [vmem:[%s3335_s3 + $0x60] sm:$0xff] }
  0x7d   :  { %2334 = vmatprep.subr.bf16.mxu0 %v2615_v15  ;;  %v1625_v15 = vld [vmem:[%s3335_s3 + $0x58] sm:$0xff] }
  0x7e   :  { %2355 = vmatpush3.bf16.msra.mxu1 %v2614_v14  ;;  %v1641_v14 = vld [vmem:[%s3335_s3 + $0xd8] sm:$0xff] }
  0x7f   :  { %2356 = vmatprep.subr.bf16.mxu1 %v2616_v16  ;;  %v1640_v16 = vld [vmem:[%s3335_s3 + $0xd0] sm:$0xff] }
  0x80   :  { %2335 = vmatpush3.bf16.msra.mxu0 %v2617_v17  ;;  %v1624_v17 = vld [vmem:[%s3335_s3 + $0x50] sm:$0xff] }
  0x81   :  { %2427 = vmatprep.subr.mxu0 %v2620_v20 }
  0x82   :  { %2357 = vmatpush3.bf16.msra.mxu1 %v2618_v19  ;;  %v1639_v19 = vld [vmem:[%s3335_s3 + $0xc8] sm:$0xff] }
  0x83   :  { %1443 = vmatmul.mubr.bf16.vlgmr.msra.gmra.mxu0 %v2896_v13  ;;  %2366 = vmatprep.subr.mxu1 %v1645_v5  ;;  %v1833_v5 = vld [vmem:[%s3339_s8 + $0x18] sm:$0xff] }
  0x84   :  { %2429 = vmatprep.mubr.msk.f32.mxu0 %vm2621_vm2, %v2620_v20 }
  0x85   :  { %1483 = vmatmul.mubr.bf16.vlgmr.msra.gmra.mxu1 %v2909_v18 }
  0x86   :  { %2367 = vmatpush3.msra.mxu1 %v1629_v6 }
  0x87   :  { %2368 = vmatprep.subr.mxu1 %v1644_v7 }
  0x88   :  { %2369 = vmatpush3.msra.mxu1 %v1628_v8 }
  0x89   :  { %2370 = vmatprep.subr.mxu1 %v1643_v9 }
  0x8a   :  { %2371 = vmatpush3.msra.mxu1 %v1627_v10  ;;  %v2184_v10 = vld [vmem:[%s3340_s5] ss:$0 sm:$0xff] }
  0x8b   :  { %2372 = vmatprep.subr.mxu1 %v1642_v11 }
  0x8c   :  { %2373 = vmatpush3.msra.mxu1 %v1626_v12 }
  0x8d   :  { %2374 = vmatprep.subr.mxu1 %v1641_v14 }
  0x8e   :  { %2375 = vmatpush3.msra.mxu1 %v1625_v15 }
  0x8f   :  { %2376 = vmatprep.subr.mxu1 %v1640_v16  ;;  %v1832_v16 = vld [vmem:[%s3339_s8 + $0x10] sm:$0xff] }
  0x90   :  { %2377 = vmatpush3.msra.mxu1 %v1624_v17  ;;  %v1831_v17 = vld [vmem:[%s3339_s8 + $0x8] sm:$0xff] }
  0x91   :  { %2378 = vmatprep.subr.mxu1 %v1639_v19  ;;  %v1830_v19 = vld [vmem:[%s3339_s8] sm:$0xff] }
  0xe3   :  { %v2204_v21 = vpop.f32.mrf.mxu0 }
  0xe4   :  { %v2226_v22 = vpop.f32.mrf.mxu1 }
  0xe5   :  { %v2205_v23 = vpop.f32.mrf.mxu0 }
  0xe6   :  { %v2227_v24 = vpop.f32.mrf.mxu1  ;;  %v2206_v29 = vadd.f32 %v2205_v23, %v2204_v21  ;;  %v1534_v21 = vld [vmem:[%s3336_s4] sm:$0xf] }
  0xe7   :  { %v2207_v25 = vpop.f32.mrf.mxu0  ;;  %v2228_v30 = vadd.f32 %v2227_v24, %v2226_v22  ;;  %v1623_v22 = vld [vmem:[%s3335_s3 + $0x48] sm:$0xff]  ;;  %2428 = vmatpush3.msk.msra.mxu0 %vm1539_vm3, %v1534_v21  ;;  %v2183_v23 = vld.sshfl [vmem:[%s3337_s0] sm:$0x33 pattern:$0x76325410]  ;;  %v15_v21 = vstv %s3341_s9 }
  0xe8   :  { %v2229_v26 = vpop.f32.mrf.mxu1  ;;  %v1638_v24 = vld [vmem:[%s3335_s3 + $0xc0] sm:$0xff]  ;;  %v1654_v25 = vcombine.high %v2183_v23, %v2183_v23  ;;  %2432 = vmatprep.subr.mxu0 %v2620_v20  ;;  %2379 = vmatpush3.msra.mxu1 %v1623_v22  ;;  %16 = vst [vmem:[#allocation3] sm:$0x1] %v15_v21 }
  0xe9   :  { %v2208_v27 = vpop.f32.mrf.mxu0  ;;  %v677_v18 = vadd.f32 %v2228_v30, %v2206_v29  ;;  %v1622_v26 = vld [vmem:[%s3335_s3 + $0x40] sm:$0xff]  ;;  %2380 = vmatprep.subr.mxu1 %v1638_v24  ;;  %v1636_v29 = vld [vmem:[%s3335_s3 + $0xb0] sm:$0xff] }
  0xea   :  { %v2230_v28 = vpop.f32.mrf.mxu1  ;;  %v1637_v27 = vld [vmem:[%s3335_s3 + $0xb8] sm:$0xff]  ;;  %1721 = vmatprep.mubr.f32.mxu1 %v1654_v25  ;;  %2381 = vmatpush3.msra.mxu1 %v1622_v26  ;;  %v1620_v30 = vld [vmem:[%s3335_s3 + $0x30] sm:$0xff]  ;;  %v2185_v22 = vld [vmem:[%s3342_s7] ss:$0 sm:$0xff] }
  0xeb   :  { %v1621_v28 = vld [vmem:[%s3335_s3 + $0x38] sm:$0xff]  ;;  %2382 = vmatprep.subr.mxu1 %v1637_v27 }
  0xec   :  { %2383 = vmatpush3.msra.mxu1 %v1621_v28 }
  0xed   :  { %2384 = vmatprep.subr.mxu1 %v1636_v29 }
  0xee   :  { %2385 = vmatpush3.msra.mxu1 %v1620_v30 }
  0xef   :  { %v2186_v27 = vld [vmem:[#allocation3] ss:$0 sm:$0xff] }
 0x103   :  { %v2248_v31 = vpop.f32.mrf.mxu0 }
 0x104   :  { %v2270_v13 = vpop.f32.mrf.mxu1 }
 0x105   :  { %v2249_v32 = vpop.f32.mrf.mxu0 }
 0x106   :  { %v2250_v33 = vadd.f32 %v2249_v32, %v2248_v31  ;;  %v2271_v34 = vpop.f32.mrf.mxu1  ;;  %v1635_v31 = vld [vmem:[%s3335_s3 + $0xa8] sm:$0xff]  ;;  %v1634_v32 = vld [vmem:[%s3335_s3 + $0xa0] sm:$0xff] }
 0x107   :  { %v2251_v35 = vpop.f32.mrf.mxu0  ;;  %v2272_v37 = vadd.f32 %v2271_v34, %v2270_v13  ;;  %v1619_v13 = vld [vmem:[%s3335_s3 + $0x28] sm:$0xff]  ;;  %2386 = vmatprep.subr.mxu1 %v1635_v31  ;;  %v1617_v34 = vld [vmem:[%s3335_s3 + $0x18] sm:$0xff] }
 0x108   :  { %v717_v36 = vadd.f32 %v2250_v33, %v677_v18  ;;  %v2273_v38 = vpop.f32.mrf.mxu1  ;;  %v1618_v18 = vld [vmem:[%s3335_s3 + $0x20] sm:$0xff]  ;;  %2387 = vmatpush3.msra.mxu1 %v1619_v13  ;;  %v1633_v33 = vld [vmem:[%s3335_s3 + $0x98] sm:$0xff]  ;;  %v1632_v35 = vld [vmem:[%s3335_s3 + $0x90] sm:$0xff] }
 0x109   :  { %v2252_v40 = vpop.f32.mrf.mxu0  ;;  %2388 = vmatprep.subr.mxu1 %v1634_v32  ;;  %v1615_v38 = vld [vmem:[%s3335_s3 + $0x8] sm:$0xff] }
 0x10a   :  { %v757_v41 = vadd.f32 %v2272_v37, %v717_v36  ;;  %v2274_v42 = vpop.f32.mrf.mxu1  ;;  %2389 = vmatpush3.msra.mxu1 %v1618_v18  ;;  %v1616_v36 = vld [vmem:[%s3335_s3 + $0x10] sm:$0xff]  ;;  %v1631_v37 = vld [vmem:[%s3335_s3 + $0x88] sm:$0xff]  ;;  %v1630_v40 = vld [vmem:[%s3335_s3 + $0x80] sm:$0xff] }
 0x10b   :  { %2390 = vmatprep.subr.mxu1 %v1633_v33  ;;  %v763_v42 = vld [vmem:[#allocation2] sm:$0xf] }
 0x10c   :  { %v762_v43 = vmax.f32 %v757_v41, 0.0  ;;  %2391 = vmatpush3.msra.mxu1 %v1617_v34  ;;  %v1614_v41 = vld [vmem:[%s3335_s3] sm:$0xff] }
 0x10d   :  { %2392 = vmatprep.subr.mxu1 %v1632_v35 }
 0x10e   :  { %v765_v45 = vsel %vm764_vm1, %v762_v43, 0.0  ;;  %2393 = vmatpush3.msra.mxu1 %v1616_v36 }
 0x10f   :  { %766 = vadd.xlane.f32.xlu0 %v765_v45  ;;  %2394 = vmatprep.subr.mxu1 %v1631_v37 }
 0x110   :  { %2395 = vmatpush3.msra.mxu1 %v1615_v38 }
 0x111   :  { %2396 = vmatprep.subr.mxu1 %v1630_v40 }
 0x112   :  { %2397 = vmatpush3.msra.mxu1 %v1614_v41 }
 0x113   :  { %1722 = vmatmul.mubr.f32.vlgmr.msra.gmra.mxu1 %v2183_v23  ;;  %2467 = vmatprep.subr.mxu1 %v2620_v20 }
 0x114   :  { %2483 = vmatprep.mubr.msk.f32.mxu1 %vm2621_vm2, %v2620_v20 }
 0x123   :  { %v2292_v46 = vpop.f32.mrf.mxu0 }
 0x125   :  { %v2314_v47 = vpop.f32.mrf.mxu1  ;;  %v2293_v48 = vpop.f32.mrf.mxu0 }
 0x126   :  { %v2294_v54 = vadd.f32 %v2293_v48, %v2292_v46 }
 0x127   :  { %v2315_v49 = vpop.f32.mrf.mxu1  ;;  %v2295_v50 = vpop.f32.mrf.mxu0 }
 0x128   :  { %v2316_v55 = vadd.f32 %v2315_v49, %v2314_v47  ;;  %v1751_v50 = vld [vmem:[%s3338_s6 + $0x78] sm:$0xff] }
 0x129   :  { %v2317_v51 = vpop.f32.mrf.mxu1  ;;  %v2296_v52 = vpop.f32.mrf.mxu0 }
 0x12a   :  { %v1405_v59 = vadd.f32 %v2316_v55, %v2294_v54  ;;  %v1750_v52 = vld [vmem:[%s3338_s6 + $0x70] sm:$0xff]  ;;  %v1748_v54 = vld [vmem:[%s3338_s6 + $0x60] sm:$0xff]  ;;  %v1747_v55 = vld [vmem:[%s3338_s6 + $0x58] sm:$0xff] }
 0x12b   :  { %v2318_v53 = vpop.f32.mrf.mxu1 }
 0x12c   :  { %v1749_v53 = vld [vmem:[%s3338_s6 + $0x68] sm:$0xff] }
 0x143   :  { %v2336_v56 = vpop.f32.mrf.mxu0 }
 0x145   :  { %v2358_v57 = vpop.f32.mrf.mxu1  ;;  %v2337_v58 = vpop.f32.mrf.mxu0 }
 0x146   :  { %v2338_v39 = vadd.f32 %v2337_v58, %v2336_v56  ;;  %v1746_v56 = vld [vmem:[%s3338_s6 + $0x50] sm:$0xff]  ;;  %v1744_v58 = vld [vmem:[%s3338_s6 + $0x40] sm:$0xff] }
 0x147   :  { %v2359_v60 = vpop.f32.mrf.mxu1  ;;  %v2339_v44 = vpop.f32.mrf.mxu0 }
 0x148   :  { %v1445_v61 = vadd.f32 %v2338_v39, %v1405_v59  ;;  %v2360_v62 = vadd.f32 %v2359_v60, %v2358_v57  ;;  %v1745_v57 = vld [vmem:[%s3338_s6 + $0x48] sm:$0xff]  ;;  %v1743_v59 = vld [vmem:[%s3338_s6 + $0x38] sm:$0xff]  ;;  %v1742_v39 = vld [vmem:[%s3338_s6 + $0x30] sm:$0xff] }
 0x149   :  { %v2361_v63 = vpop.f32.mrf.mxu1  ;;  %v2340_v0 = vpop.f32.mrf.mxu0  ;;  %v1741_v60 = vld [vmem:[%s3338_s6 + $0x28] sm:$0xff]  ;;  %v1740_v44 = vld [vmem:[%s3338_s6 + $0x20] sm:$0xff] }
 0x14a   :  { %v1485_v1 = vadd.f32 %v2360_v62, %v1445_v61  ;;  %v1739_v61 = vld [vmem:[%s3338_s6 + $0x18] sm:$0xff]  ;;  %v1738_v62 = vld [vmem:[%s3338_s6 + $0x10] sm:$0xff]  ;;  %v1737_v63 = vld [vmem:[%s3338_s6 + $0x8] sm:$0xff] }
 0x14b   :  { %v2362_v2 = vpop.f32.mrf.mxu1  ;;  %v1736_v0 = vld [vmem:[%s3338_s6] sm:$0xff] }
 0x14c   :  { %v1490_v3 = vmax.f32 %v1485_v1, 0.0  ;;  %v1837_v1 = vld [vmem:[%s3339_s8 + $0x38] sm:$0xff]  ;;  %v1836_v2 = vld [vmem:[%s3339_s8 + $0x30] sm:$0xff] }
 0x14d   :  { %2468 = vmatpush3.msra.mxu1 %v1837_v1 }
 0x14e   :  { %v1492_v4 = vsel %vm764_vm1, %v1490_v3, 0.0  ;;  %2469 = vmatprep.subr.mxu1 %v2620_v20  ;;  %v1835_v3 = vld [vmem:[%s3339_s8 + $0x28] sm:$0xff] }
 0x14f   :  { %1493 = vadd.xlane.f32.xlu0 %v1492_v4  ;;  %2470 = vmatpush3.msra.mxu1 %v1836_v2  ;;  %v1834_v4 = vld [vmem:[%s3339_s8 + $0x20] sm:$0xff] }
 0x150   :  { %2471 = vmatprep.subr.mxu1 %v2620_v20 }
 0x151   :  { %2472 = vmatpush3.msra.mxu1 %v1835_v3 }
 0x152   :  { %2473 = vmatprep.subr.mxu1 %v2620_v20 }
 0x153   :  { %2474 = vmatpush3.msra.mxu1 %v1834_v4 }
 0x154   :  { %2475 = vmatprep.subr.mxu1 %v2620_v20 }
 0x155   :  { %2476 = vmatpush3.msra.mxu1 %v1833_v5 }
 0x156   :  { %2477 = vmatprep.subr.mxu1 %v2620_v20 }
 0x157   :  { %2478 = vmatpush3.msra.mxu1 %v1832_v16 }
 0x158   :  { %2479 = vmatprep.subr.mxu1 %v2620_v20 }
 0x159   :  { %2480 = vmatpush3.msra.mxu1 %v1831_v17 }
 0x15a   :  { %2481 = vmatprep.subr.mxu1 %v2620_v20 }
 0x15b   :  { %2482 = vmatpush3.msra.mxu1 %v1830_v19 }
 0x198   :  { %v767_v43 = vpop.xlane.xlu0 %766 }
 0x199   :  { %v768_v45 = vadd.f32 %v767_v43, %v763_v42 }
 0x19b   :  { %770 = vst.msk [vmem:[#allocation2] sm:$0xf] %vm769_vm4, %v768_v45 }
 0x1a2   :  { %v1491_v46 = vld [vmem:[#allocation2] sm:$0xf] }
 0x1d3   :  { %v2398_v6 = vpop.f32.mrf.mxu1 }
 0x1d5   :  { %v2399_v7 = vpop.f32.mrf.mxu1 }
 0x1d6   :  { %v2400_v8 = vadd.f32 %v2399_v7, %v2398_v6 }
 0x1d8   :  { %v1494_v47 = vpop.xlane.xlu0 %1493 }
 0x1d9   :  { %v1495_v48 = vadd.f32 %v1494_v47, %v1491_v46 }
 0x1db   :  { %1497 = vst.msk [vmem:[#allocation2] sm:$0xf] %vm1496_vm5, %v1495_v48 }
 0x1e2   :  { %v1501_v49 = vld [vmem:[#allocation2] sm:$0xf] }
 0x1e3   :  { %1502 = vxpose.xlu1.b32.start.end [1/1] (short) (narrow) %v1501_v49, 8 }
 0x25f   :  { %v1518_v51 = vpop.trf.xlu1 }
 0x260   :  { %2430 = vmatmul.mubr.msk.f32.vlgmr.msra.gmra.mxu0 %vm1535_vm6, %v1518_v51 }
 0x261   :  { %2433 = vmatpush3.msra.mxu0 %v1751_v50  ;;  %2464 = vmatprep.mubr.msk.f32.mxu0 %vm2621_vm2, %v2620_v20 }
 0x262   :  { %2434 = vmatprep.subr.mxu0 %v2620_v20 }
 0x263   :  { %2435 = vmatpush3.msra.mxu0 %v1750_v52 }
 0x264   :  { %2436 = vmatprep.subr.mxu0 %v2620_v20 }
 0x265   :  { %2437 = vmatpush3.msra.mxu0 %v1749_v53 }
 0x266   :  { %2438 = vmatprep.subr.mxu0 %v2620_v20 }
 0x267   :  { %2439 = vmatpush3.msra.mxu0 %v1748_v54 }
 0x268   :  { %2440 = vmatprep.subr.mxu0 %v2620_v20 }
 0x269   :  { %2441 = vmatpush3.msra.mxu0 %v1747_v55 }
 0x26a   :  { %2442 = vmatprep.subr.mxu0 %v2620_v20 }
 0x26b   :  { %2443 = vmatpush3.msra.mxu0 %v1746_v56 }
 0x26c   :  { %2444 = vmatprep.subr.mxu0 %v2620_v20 }
 0x26d   :  { %2445 = vmatpush3.msra.mxu0 %v1745_v57 }
 0x26e   :  { %2446 = vmatprep.subr.mxu0 %v2620_v20 }
 0x26f   :  { %2447 = vmatpush3.msra.mxu0 %v1744_v58 }
 0x270   :  { %2448 = vmatprep.subr.mxu0 %v2620_v20 }
 0x271   :  { %2449 = vmatpush3.msra.mxu0 %v1743_v59 }
 0x272   :  { %2450 = vmatprep.subr.mxu0 %v2620_v20 }
 0x273   :  { %2451 = vmatpush3.msra.mxu0 %v1742_v39 }
 0x274   :  { %2452 = vmatprep.subr.mxu0 %v2620_v20 }
 0x275   :  { %2453 = vmatpush3.msra.mxu0 %v1741_v60 }
 0x276   :  { %2454 = vmatprep.subr.mxu0 %v2620_v20 }
 0x277   :  { %2455 = vmatpush3.msra.mxu0 %v1740_v44 }
 0x278   :  { %2456 = vmatprep.subr.mxu0 %v2620_v20 }
 0x279   :  { %2457 = vmatpush3.msra.mxu0 %v1739_v61 }
 0x27a   :  { %2458 = vmatprep.subr.mxu0 %v2620_v20 }
 0x27b   :  { %2459 = vmatpush3.msra.mxu0 %v1738_v62 }
 0x27c   :  { %2460 = vmatprep.subr.mxu0 %v2620_v20 }
 0x27d   :  { %2461 = vmatpush3.msra.mxu0 %v1737_v63 }
 0x27e   :  { %2462 = vmatprep.subr.mxu0 %v2620_v20 }
 0x27f   :  { %2463 = vmatpush3.msra.mxu0 %v1736_v0 }
 0x320   :  { %v1609_v9 = vpop.f32.mrf.mxu0 }
 0x321   :  { %v1724_v11 = vadd.f32 %v2400_v8, %v1609_v9 }
 0x322   :  { %v2431_v12 = vpop.f32.mrf.mxu0 }
 0x323   :  { %v1734_v14 = vadd.f32 %v2184_v10, %v1724_v11 }
 0x325   :  { %v1735_v15 = vmax.f32 %v1734_v14, 0.0 }
 0x327   :  { %2465 = vmatmul.mubr.f32.vlgmr.msra.gmra.mxu0 %v1735_v15 }
 0x3e7   :  { %v1825_v23 = vpop.f32.mrf.mxu0 }
 0x3e8   :  { %v1826_v24 = vadd.f32 %v2185_v22, %v1825_v23 }
 0x3e9   :  { %v2466_v25 = vpop.f32.mrf.mxu0 }
 0x3ea   :  { %v1829_v26 = vmax.f32 %v1826_v24, 0.0 }
 0x3ec   :  { %2484 = vmatmul.mubr.msk.f32.vlgmr.msra.gmra.mxu1 %vm1845_vm7, %v1829_v26 }
 0x4ac   :  { %v1915_v28 = vpop.f32.mrf.mxu1 }
 0x4ad   :  { %v1916_v20 = vadd.f32 %v2186_v27, %v1915_v28 }
 0x4ae   :  { %v2485_v29 = vpop.f32.mrf.mxu1 }
 0x4af   :  { %1920 = vst.msk [vmem:[%s3343_s10] sm:$0x3] %vm1919_vm8, %v1916_v20 }

</bundles_post_ra>
